<compile_context>
chip_gen: v7x
topology: tpu7x:2x2x1
jax: 0.10.0
libtpu: 0.0.40
codegen_flags: <defaults>
</compile_context>

<pallas_src>
import functools

import jax
import jax.numpy as jnp
from jax.experimental import pallas as pl
from jax.experimental.pallas import tpu as pltpu

D_IN = 784          # input feature dim (kept unpadded in HBM)
H1 = 128            # fc1 / fc1_1 width (already lane-aligned)
H3 = 64             # fc2 true output width
OUT = 10            # fc3 true output width
OUT_PAD = 128       # lane-dense padded hidden2 / output width


# --------------------------------------------------------------------------------------
# Kernel: four MXU matmuls (bf16 operands, f32 accumulation) + f32 bias/ReLU, all
# VMEM-resident.  Rows are independent, so garbage rows in a ragged last x block stay
# confined to rows whose output stores are masked / sliced away.
# --------------------------------------------------------------------------------------
def mlp_kernel(x_ref, w1_ref, b1_ref, w11_ref, b11_ref,
               w2_ref, b2_ref, w3_ref, b3_ref, o_ref):
    x = x_ref[...].astype(jnp.bfloat16)
    h = jnp.dot(x, w1_ref[...], preferred_element_type=jnp.float32) + b1_ref[...]
    h = jnp.maximum(h, 0.0)
    h = jnp.dot(h.astype(jnp.bfloat16), w11_ref[...],
                preferred_element_type=jnp.float32) + b11_ref[...]
    h = jnp.maximum(h, 0.0)
    h = jnp.dot(h.astype(jnp.bfloat16), w2_ref[...],
                preferred_element_type=jnp.float32) + b2_ref[...]
    h = jnp.maximum(h, 0.0)
    o = jnp.dot(h.astype(jnp.bfloat16), w3_ref[...],
                preferred_element_type=jnp.float32) + b3_ref[...]
    o_ref[...] = o.astype(o_ref.dtype)


# --------------------------------------------------------------------------------------
# Generation-aware tuning (queried once, outside the jitted path).
# --------------------------------------------------------------------------------------
@functools.lru_cache(maxsize=1)
def _tpu_tuning():
    kind = ""
    try:
        kind = jax.devices()[0].device_kind.lower()
    except Exception:
        pass
    vmem_cap = None
    try:
        vmem_cap = int(pltpu.get_tpu_info().vmem_capacity_bytes)
    except Exception:
        pass

    if "v7" in kind or (vmem_cap is not None and 48 * 2**20 <= vmem_cap < 120 * 2**20):
        # v7x: 64 MiB VMEM per TC, 2 TensorCores -> modest tile, >= 2 steps per core.
        return {"max_tb": 2048, "vmem_limit": 40 * 2**20, "min_steps": 4}
    if "v5" in kind or "v6" in kind or (vmem_cap is not None and vmem_cap >= 120 * 2**20):
        # v5e / v6e: 128 MiB VMEM, single TensorCore -> biggest tile wins.
        return {"max_tb": 4096, "vmem_limit": 64 * 2**20, "min_steps": 1}
    # Unknown generation: conservative settings known to run on v5e/v6e/v7x.
    return {"max_tb": 1024, "vmem_limit": 32 * 2**20, "min_steps": 2}


def _choose_tile(batch, block_b, tune):
    """Static batch-tile choice (multiple of 8, capped by generation & batch)."""
    bp8 = 8 * ((batch + 7) // 8)                       # 8-aligned batch
    if block_b is None:
        tb = tune["max_tb"]
    else:
        tb = max(8, (block_b // 8) * 8)                # honor explicit request
    tb = min(tb, tune["max_tb"], bp8)
    # Multi-TensorCore chips: keep >= min_steps grid steps when the batch allows it
    # (only applied when the caller did not force a tile size).
    min_steps = tune["min_steps"]
    if block_b is None and min_steps > 1 and bp8 >= 8 * min_steps:
        tb = min(tb, max(8, (bp8 // min_steps // 8) * 8))
    return tb


# --------------------------------------------------------------------------------------
# Weight preparation: done ONCE (pad to lane-aligned shapes, cast matmul operands to
# bf16, reshape biases).  Keeps the per-call jitted path free of weight HBM traffic.
# --------------------------------------------------------------------------------------
def prepare_params(params):
    w1, b1, w11, b11, w2, b2, w3, b3 = params
    w1p = jnp.asarray(w1, jnp.bfloat16)                                          # (784, 128)
    w11p = jnp.asarray(w11, jnp.bfloat16)                                        # (128, 128)
    w2p = jnp.pad(w2, ((0, 0), (0, OUT_PAD - H3))).astype(jnp.bfloat16)          # (128, 128)
    w3p = jnp.pad(w3, ((0, OUT_PAD - H3), (0, OUT_PAD - OUT))).astype(jnp.bfloat16)  # (128,128)
    b1p = jnp.asarray(b1, jnp.float32).reshape(1, H1)
    b11p = jnp.asarray(b11, jnp.float32).reshape(1, H1)
    b2p = jnp.pad(jnp.asarray(b2, jnp.float32), (0, OUT_PAD - H3)).reshape(1, OUT_PAD)
    b3p = jnp.pad(jnp.asarray(b3, jnp.float32), (0, OUT_PAD - OUT)).reshape(1, OUT_PAD)
    prepared = (w1p, b1p, w11p, b11p, w2p, b2p, w3p, b3p)
    return tuple(jax.device_put(t) for t in prepared)


# --------------------------------------------------------------------------------------
# Forward pass.
# --------------------------------------------------------------------------------------
@functools.partial(jax.jit, static_argnames=("tb", "vmem_limit"))
def _mlp_forward_impl(x2d, prepared, tb, vmem_limit):
    B = x2d.shape[0]
    w1p, b1p, w11p, b11p, w2p, b2p, w3p, b3p = prepared
    grid = (pl.cdiv(B, tb),)

    # Weights/biases total < 0.5 MiB -> whole arrays resident in VMEM (constant block
    # index); only the batch dimension of x / out is tiled across the grid.
    full = lambda shape: pl.BlockSpec(shape, lambda i: (0,) * len(shape))

    out = pl.pallas_call(
        mlp_kernel,
        out_shape=jax.ShapeDtypeStruct((B, OUT_PAD), jnp.float32),
        grid_spec=pltpu.PrefetchScalarGridSpec(
            num_scalar_prefetch=0,
            grid=grid,
            in_specs=[
                # x: unpadded [B, 784] in HBM; last block dim == full array dim (legal),
                # ragged last batch block handled by Pallas masking.
                pl.BlockSpec((tb, D_IN), lambda i: (i, 0)),
                full((D_IN, H1)),        full((1, H1)),        # fc1
                full((H1, H1)),          full((1, H1)),        # fc1_1
                full((H1, OUT_PAD)),     full((1, OUT_PAD)),   # fc2  (N padded 64 -> 128)
                full((OUT_PAD, OUT_PAD)), full((1, OUT_PAD)),  # fc3  (padded to 128x128)
            ],
            out_specs=pl.BlockSpec((tb, OUT_PAD), lambda i: (i, 0)),  # lane-dense output
        ),
        compiler_params=pltpu.CompilerParams(
            dimension_semantics=("parallel",),
            vmem_limit_bytes=vmem_limit,
        ),
    )(x2d, w1p, b1p, w11p, b11p, w2p, b2p, w3p, b3p)

    return out[:, :OUT]


def mlp_forward(x, prepared_params, block_b=None):
    """x: [B, 1, 28, 28] or [B, 784] (f32 or bf16). Returns logits [B, 10] float32."""
    x2d = x.reshape(-1, D_IN)
    tune = _tpu_tuning()
    tb = _choose_tile(x2d.shape[0], block_b, tune)
    return _mlp_forward_impl(x2d, prepared_params, tb, tune["vmem_limit"])


# --------------------------------------------------------------------------------------
# Init + references.
# --------------------------------------------------------------------------------------
def init_params(key):
    """Deterministic init mirroring nn.Linear's U(-1/sqrt(fan_in), 1/sqrt(fan_in))."""
    dims = [(784, 128), (128, 128), (128, 64), (64, 10)]
    params = []
    for i, (fan_in, fan_out) in enumerate(dims):
        kw, kb = jax.random.split(jax.random.fold_in(key, i))
        bound = 1.0 / jnp.sqrt(float(fan_in))
        # stored as (in, out) == transposed PyTorch weight
        w = jax.random.uniform(kw, (fan_in, fan_out), jnp.float32, -bound, bound)
        b = jax.random.uniform(kb, (fan_out,), jnp.float32, -bound, bound)
        params += [w, b]
    return tuple(params)


def mlp_reference_bf16(x, params):
    """Reference matching the kernel's math path: bf16 matmul operands, f32 accumulate."""
    w1, b1, w11, b11, w2, b2, w3, b3 = params
    x = x.reshape(-1, D_IN)

    def lin(a, w, b):
        return jnp.dot(a.astype(jnp.bfloat16), w.astype(jnp.bfloat16),
                       preferred_element_type=jnp.float32) + b

    h = jax.nn.relu(lin(x, w1, b1))
    h = jax.nn.relu(lin(h, w11, b11))
    h = jax.nn.relu(lin(h, w2, b2))
    return lin(h, w3, b3)


def mlp_reference_f32(x, params):
    w1, b1, w11, b11, w2, b2, w3, b3 = params
    x = x.reshape(-1, D_IN)
    h = jax.nn.relu(x @ w1 + b1)
    h = jax.nn.relu(h @ w11 + b11)
    h = jax.nn.relu(h @ w2 + b2)
    return h @ w3 + b3


if __name__ == "__main__":
    key = jax.random.PRNGKey(0)
    kx, kp = jax.random.split(key)
    params = init_params(kp)
    prepared = prepare_params(params)   # padded bf16 weights cached once, reused per call

    # Small MNIST-like batch, NCHW like PyTorch: [2, 1, 28, 28]
    x = jax.random.normal(kx, (2, 1, 28, 28), jnp.float32)
    out = jax.block_until_ready(mlp_forward(x, prepared))
    assert out.shape == (2, 10), out.shape

    ref_bf16 = mlp_reference_bf16(x, params)
    ref_f32 = mlp_reference_f32(x, params)
    assert jnp.allclose(out, ref_bf16, atol=1e-3, rtol=1e-3), (
        float(jnp.max(jnp.abs(out - ref_bf16))))
    # bf16 MXU operands vs. pure-f32 math -> loose semantic sanity check only.
    assert jnp.allclose(out, ref_f32, atol=5e-2, rtol=5e-2), (
        float(jnp.max(jnp.abs(out - ref_f32))))

    # Multi-step grid with a ragged last block (B=37, forced small tile) -> confirms the
    # unpadded-batch / masked-last-block path is correct.
    x2 = jax.random.normal(jax.random.fold_in(kx, 1), (37, 784), jnp.float32)
    out2 = jax.block_until_ready(mlp_forward(x2, prepared, block_b=16))
    ref2 = mlp_reference_bf16(x2, params)
    assert out2.shape == (37, 10), out2.shape
    assert jnp.allclose(out2, ref2, atol=1e-3, rtol=1e-3), (
        float(jnp.max(jnp.abs(out2 - ref2))))

    # bf16 input path (caller-provided bf16 x is DMA'd directly; same math as the ref,
    # which also rounds x to bf16 before the matmul).
    out3 = jax.block_until_ready(mlp_forward(x2.astype(jnp.bfloat16), prepared, block_b=16))
    assert jnp.allclose(out3, ref2, atol=1e-3, rtol=1e-3), (
        float(jnp.max(jnp.abs(out3 - ref2))))

    print("KERNEL_OK")
</pallas_src>

<mosaic_0001>
module attributes {stable_mosaic.version = 11 : i64} {
  func.func @mlp_kernel(%arg0: i32, %arg1: memref<8x784xf32, #tpu.memory_space<vmem>>, %arg2: memref<784x128xbf16, #tpu.memory_space<vmem>>, %arg3: memref<1x128xf32, #tpu.memory_space<vmem>>, %arg4: memref<128x128xbf16, #tpu.memory_space<vmem>>, %arg5: memref<1x128xf32, #tpu.memory_space<vmem>>, %arg6: memref<128x128xbf16, #tpu.memory_space<vmem>>, %arg7: memref<1x128xf32, #tpu.memory_space<vmem>>, %arg8: memref<128x128xbf16, #tpu.memory_space<vmem>>, %arg9: memref<1x128xf32, #tpu.memory_space<vmem>>, %arg10: memref<8x128xf32, #tpu.memory_space<vmem>>) attributes {dimension_semantics = [#tpu.dimension_semantics<parallel>], iteration_bounds = array<i64: 1>, scalar_prefetch = 0 : i64, scratch_operands = 0 : i64, tpu.core_type = #tpu.core_type<tc>, window_params = [{transform_indices = @transform_0, window_bounds = array<i64: 8, 784>}, {pipeline_mode = #tpu.pipeline_mode<synchronous>, transform_indices = @transform_1, window_bounds = array<i64: 784, 128>}, {pipeline_mode = #tpu.pipeline_mode<synchronous>, transform_indices = @transform_2, window_bounds = array<i64: 1, 128>}, {pipeline_mode = #tpu.pipeline_mode<synchronous>, transform_indices = @transform_3, window_bounds = array<i64: 128, 128>}, {pipeline_mode = #tpu.pipeline_mode<synchronous>, transform_indices = @transform_4, window_bounds = array<i64: 1, 128>}, {pipeline_mode = #tpu.pipeline_mode<synchronous>, transform_indices = @transform_5, window_bounds = array<i64: 128, 128>}, {pipeline_mode = #tpu.pipeline_mode<synchronous>, transform_indices = @transform_6, window_bounds = array<i64: 1, 128>}, {pipeline_mode = #tpu.pipeline_mode<synchronous>, transform_indices = @transform_7, window_bounds = array<i64: 128, 128>}, {pipeline_mode = #tpu.pipeline_mode<synchronous>, transform_indices = @transform_8, window_bounds = array<i64: 1, 128>}, {transform_indices = @transform_9, window_bounds = array<i64: 8, 128>}]} {
    %c0 = arith.constant 0 : index
    %c0_0 = arith.constant 0 : index
    %0 = vector.load %arg1[%c0, %c0_0] : memref<8x784xf32, #tpu.memory_space<vmem>>, vector<8x784xf32>
    %1 = arith.truncf %0 : vector<8x784xf32> to vector<8x784xbf16>
    %c0_1 = arith.constant 0 : index
    %c0_2 = arith.constant 0 : index
    %2 = vector.load %arg2[%c0_1, %c0_2] : memref<784x128xbf16, #tpu.memory_space<vmem>>, vector<784x128xbf16>
    %cst = arith.constant dense<0.000000e+00> : vector<8x128xf32>
    %3 = tpu.matmul %1, %2, %cst {dimension_numbers = #tpu.dot_dimension_numbers<[1], [0], [0], [1], [0, 0, 1, 1], [], []>} : vector<8x784xbf16>, vector<784x128xbf16>, vector<8x128xf32> -> vector<8x128xf32>
    %c0_3 = arith.constant 0 : index
    %c0_4 = arith.constant 0 : index
    %4 = vector.load %arg3[%c0_3, %c0_4] : memref<1x128xf32, #tpu.memory_space<vmem>>, vector<1x128xf32>
    %5 = vector.broadcast %4 : vector<1x128xf32> to vector<8x128xf32>
    %6 = arith.addf %3, %5 : vector<8x128xf32>
    %cst_5 = arith.constant 0.000000e+00 : f32
    %7 = vector.broadcast %cst_5 : f32 to vector<8x128xf32>
    %8 = arith.maximumf %6, %7 : vector<8x128xf32>
    %9 = arith.truncf %8 : vector<8x128xf32> to vector<8x128xbf16>
    %c0_6 = arith.constant 0 : index
    %c0_7 = arith.constant 0 : index
    %10 = vector.load %arg4[%c0_6, %c0_7] : memref<128x128xbf16, #tpu.memory_space<vmem>>, vector<128x128xbf16>
    %cst_8 = arith.constant dense<0.000000e+00> : vector<8x128xf32>
    %11 = tpu.matmul %9, %10, %cst_8 {dimension_numbers = #tpu.dot_dimension_numbers<[1], [0], [0], [1], [0, 0, 1, 1], [], []>} : vector<8x128xbf16>, vector<128x128xbf16>, vector<8x128xf32> -> vector<8x128xf32>
    %c0_9 = arith.constant 0 : index
    %c0_10 = arith.constant 0 : index
    %12 = vector.load %arg5[%c0_9, %c0_10] : memref<1x128xf32, #tpu.memory_space<vmem>>, vector<1x128xf32>
    %13 = vector.broadcast %12 : vector<1x128xf32> to vector<8x128xf32>
    %14 = arith.addf %11, %13 : vector<8x128xf32>
    %cst_11 = arith.constant 0.000000e+00 : f32
    %15 = vector.broadcast %cst_11 : f32 to vector<8x128xf32>
    %16 = arith.maximumf %14, %15 : vector<8x128xf32>
    %17 = arith.truncf %16 : vector<8x128xf32> to vector<8x128xbf16>
    %c0_12 = arith.constant 0 : index
    %c0_13 = arith.constant 0 : index
    %18 = vector.load %arg6[%c0_12, %c0_13] : memref<128x128xbf16, #tpu.memory_space<vmem>>, vector<128x128xbf16>
    %cst_14 = arith.constant dense<0.000000e+00> : vector<8x128xf32>
    %19 = tpu.matmul %17, %18, %cst_14 {dimension_numbers = #tpu.dot_dimension_numbers<[1], [0], [0], [1], [0, 0, 1, 1], [], []>} : vector<8x128xbf16>, vector<128x128xbf16>, vector<8x128xf32> -> vector<8x128xf32>
    %c0_15 = arith.constant 0 : index
    %c0_16 = arith.constant 0 : index
    %20 = vector.load %arg7[%c0_15, %c0_16] : memref<1x128xf32, #tpu.memory_space<vmem>>, vector<1x128xf32>
    %21 = vector.broadcast %20 : vector<1x128xf32> to vector<8x128xf32>
    %22 = arith.addf %19, %21 : vector<8x128xf32>
    %cst_17 = arith.constant 0.000000e+00 : f32
    %23 = vector.broadcast %cst_17 : f32 to vector<8x128xf32>
    %24 = arith.maximumf %22, %23 : vector<8x128xf32>
    %25 = arith.truncf %24 : vector<8x128xf32> to vector<8x128xbf16>
    %c0_18 = arith.constant 0 : index
    %c0_19 = arith.constant 0 : index
    %26 = vector.load %arg8[%c0_18, %c0_19] : memref<128x128xbf16, #tpu.memory_space<vmem>>, vector<128x128xbf16>
    %cst_20 = arith.constant dense<0.000000e+00> : vector<8x128xf32>
    %27 = tpu.matmul %25, %26, %cst_20 {dimension_numbers = #tpu.dot_dimension_numbers<[1], [0], [0], [1], [0, 0, 1, 1], [], []>} : vector<8x128xbf16>, vector<128x128xbf16>, vector<8x128xf32> -> vector<8x128xf32>
    %c0_21 = arith.constant 0 : index
    %c0_22 = arith.constant 0 : index
    %28 = vector.load %arg9[%c0_21, %c0_22] : memref<1x128xf32, #tpu.memory_space<vmem>>, vector<1x128xf32>
    %29 = vector.broadcast %28 : vector<1x128xf32> to vector<8x128xf32>
    %30 = arith.addf %27, %29 : vector<8x128xf32>
    %c0_23 = arith.constant 0 : index
    %c0_24 = arith.constant 0 : index
    %31 = vector.load %arg10[%c0_23, %c0_24] : memref<8x128xf32, #tpu.memory_space<vmem>>, vector<8x128xf32>
    tpu.vector_store %arg10[%c0_23, %c0_24], %30 {strides = array<i32>} : memref<8x128xf32, #tpu.memory_space<vmem>>, vector<8x128xf32>,
    return
  }
  func.func @transform_0(%arg0: i32) -> (i32, i32) {
    %c0_i32 = arith.constant 0 : i32
    %c0_i32_0 = arith.constant 0 : i32
    return %arg0, %c0_i32 : i32, i32
  }
  func.func @transform_1(%arg0: i32) -> (i32, i32) {
    %c0_i32 = arith.constant 0 : i32
    %c0_i32_0 = arith.constant 0 : i32
    %c0_i32_1 = arith.constant 0 : i32
    return %c0_i32, %c0_i32_0 : i32, i32
  }
  func.func @transform_2(%arg0: i32) -> (i32, i32) {
    %c0_i32 = arith.constant 0 : i32
    %c0_i32_0 = arith.constant 0 : i32
    %c0_i32_1 = arith.constant 0 : i32
    return %c0_i32, %c0_i32_0 : i32, i32
  }
  func.func @transform_3(%arg0: i32) -> (i32, i32) {
    %c0_i32 = arith.constant 0 : i32
    %c0_i32_0 = arith.constant 0 : i32
    %c0_i32_1 = arith.constant 0 : i32
    return %c0_i32, %c0_i32_0 : i32, i32
  }
  func.func @transform_4(%arg0: i32) -> (i32, i32) {
    %c0_i32 = arith.constant 0 : i32
    %c0_i32_0 = arith.constant 0 : i32
    %c0_i32_1 = arith.constant 0 : i32
    return %c0_i32, %c0_i32_0 : i32, i32
  }
  func.func @transform_5(%arg0: i32) -> (i32, i32) {
    %c0_i32 = arith.constant 0 : i32
    %c0_i32_0 = arith.constant 0 : i32
    %c0_i32_1 = arith.constant 0 : i32
    return %c0_i32, %c0_i32_0 : i32, i32
  }
  func.func @transform_6(%arg0: i32) -> (i32, i32) {
    %c0_i32 = arith.constant 0 : i32
    %c0_i32_0 = arith.constant 0 : i32
    %c0_i32_1 = arith.constant 0 : i32
    return %c0_i32, %c0_i32_0 : i32, i32
  }
  func.func @transform_7(%arg0: i32) -> (i32, i32) {
    %c0_i32 = arith.constant 0 : i32
    %c0_i32_0 = arith.constant 0 : i32
    %c0_i32_1 = arith.constant 0 : i32
    return %c0_i32, %c0_i32_0 : i32, i32
  }
  func.func @transform_8(%arg0: i32) -> (i32, i32) {
    %c0_i32 = arith.constant 0 : i32
    %c0_i32_0 = arith.constant 0 : i32
    %c0_i32_1 = arith.constant 0 : i32
    return %c0_i32, %c0_i32_0 : i32, i32
  }
  func.func @transform_9(%arg0: i32) -> (i32, i32) {
    %c0_i32 = arith.constant 0 : i32
    %c0_i32_0 = arith.constant 0 : i32
    return %arg0, %c0_i32 : i32, i32
  }
}

</mosaic_0001>

<bundles_post_ra>
// kernel: _mlp_forward_impl.1
= control target key start
LH: loop header
LB: loop body
LE: loop exit
PB: predicated region body
PF: predicated region fallthrough
CT: control target
= control target key end

     0   :  { %14 = vsyncpa [#allocation3], 0  ;;  %s1809_s0 = inlined_call_operand.hbm [shape: f32[2,784], index: 0, kind: input, shape index: {}]   ;;  %s1810_s1 = inlined_call_operand.hbm [shape: bf16[784,128], index: 1, kind: input, shape index: {}]   ;;  %s1811_s2 = inlined_call_operand.vmem [shape: f32[1,128], index: 2, kind: input, shape index: {}]   ;;  %s1812_s3 = inlined_call_operand.hbm [shape: bf16[128,128], index: 3, kind: input, shape index: {}]   ;;  %s1813_s4 = inlined_call_operand.vmem [shape: f32[1,128], index: 4, kind: input, shape index: {}]   ;;  %s1814_s5 = inlined_call_operand.hbm [shape: bf16[128,128], index: 5, kind: input, shape index: {}]   ;;  %s1815_s6 = inlined_call_operand.vmem [shape: f32[1,128], index: 6, kind: input, shape index: {}]   ;;  %s1816_s7 = inlined_call_operand.hbm [shape: bf16[128,128], index: 7, kind: input, shape index: {}]   ;;  %s1817_s8 = inlined_call_operand.vmem [shape: f32[1,128], index: 8, kind: input, shape index: {}]   ;;  %s1818_s9 = inlined_call_operand.hbm [shape: f32[2,128], index: 9, kind: output, shape index: {}]  }
   0x1   :  { %15 = vsyncpa [#allocation6], 0 }
   0x2   :  { %16 = vsyncpa [#allocation9], 0 }
   0x3   :  { %17 = vsyncpa [#allocation4], 0 }
   0x4   :  { %22 = vsyncadd [#allocation3], 672  ;;  %s1604_s30 = smov [#allocation5]   ;;  %s1464_s13 = scalar_lea.hbm %s1810_s1, 6272 }
   0x5   :  { %s35_s10 = sshll.u32 %s1604_s30, 4  ;;  %p1465_p0 = scmp.ne.s32.totalorder %s1810_s1, %s1464_s13  ;;  %s36_s10 = int_to_ptr.vmem [resolvable:$true] %s35_s10 }
   0x6   :  { %p1468_p1 = scmp.lt.u32.totalorder %s1464_s13, %s1810_s1 }
   0x8   :  { %p1470_p2 = pnand %p1468_p1, %p1465_p0 }
   0xa   :  { %1473 = shalt.err (!%p1470_p2)
}
   0xb   :  { %s1474_s18 = scalar_lea.vmem %s36_s10, 6272  ;;  %p1479_p4 = scmp.lt.s32.totalorder %s36_s10, %s36_s10 }
   0xc   :  { %p1475_p3 = scmp.ne.s32.totalorder %s36_s10, %s1474_s18  ;;  %p1480_p5 = scmp.lt.s32.totalorder %s1474_s18, %s1474_s18 }
   0xe   :  { %p1481_p6 = por %p1480_p5, %p1479_p4 }
  0x10   :  { %p1482_p7 = pnand %p1481_p6, %p1475_p3 }
  0x12   :  { %1485 = shalt.err (!%p1482_p7)
}
  0x13   :  { %s1605_s19 = smov 64   ;;  %s1606_s20 = smov 4  }
  0x14   :  { %41 = dma.hbm_to_vmem [thread:$0]  %s1810_s1, 6272, %s36_s10, [#allocation6], %s1605_s19, %s1605_s19, %s1606_s20  }
  0x15   :  { %s1607_s23 = smov [#allocation8]   ;;  %s1608_s25 = smov [#allocation2]  }
  0x16   :  { %s63_s24 = sshll.u32 %s1607_s23, 4  ;;  %s23_s26 = sshll.u32 %s1608_s25, 4  ;;  %s64_s24 = int_to_ptr.vmem [resolvable:$true] %s63_s24  ;;  %s24_s26 = int_to_ptr.vmem [resolvable:$true] %s23_s26 }
  0x17   :  { %s1486_s29 = scalar_lea.hbm %s1814_s5, 1024 }
  0x18   :  { %p1487_p8 = scmp.ne.s32.totalorder %s1814_s5, %s1486_s29  ;;  %p1490_p9 = scmp.lt.u32.totalorder %s1486_s29, %s1814_s5 }
  0x1a   :  { %p1492_p10 = pnand %p1490_p9, %p1487_p8 }
  0x1c   :  { %1495 = shalt.err (!%p1492_p10)
}
  0x1d   :  { %s1496_s1 = scalar_lea.vmem %s64_s24, 1024  ;;  %p1501_p12 = scmp.lt.s32.totalorder %s64_s24, %s64_s24 }
  0x1e   :  { %p1497_p11 = scmp.ne.s32.totalorder %s64_s24, %s1496_s1  ;;  %p1502_p13 = scmp.lt.s32.totalorder %s1496_s1, %s1496_s1 }
  0x20   :  { %p1503_p0 = por %p1502_p13, %p1501_p12 }
  0x22   :  { %p1504_p1 = pnand %p1503_p0, %p1497_p11 }
  0x24   :  { %1507 = shalt.err (!%p1504_p1)
}
  0x25   :  { %69 = dma.hbm_to_vmem [thread:$0]  %s1814_s5, 1024, %s64_s24, [#allocation9], %s1605_s19, %s1605_s19, %s1606_s20  }
  0x26   :  { %s1508_s17 = scalar_lea.hbm %s1809_s0, 224 }
  0x27   :  { %p1509_p2 = scmp.ne.s32.totalorder %s1809_s0, %s1508_s17  ;;  %p1512_p3 = scmp.lt.u32.totalorder %s1508_s17, %s1809_s0 }
  0x29   :  { %p1514_p4 = pnand %p1512_p3, %p1509_p2 }
  0x2b   :  { %1517 = shalt.err (!%p1514_p4)
}
  0x2c   :  { %s1518_s25 = scalar_lea.vmem %s24_s26, 224  ;;  %s1522_s27 = scalar_lea.vmem %s24_s26, 896 }
  0x2d   :  { %p1519_p5 = scmp.ne.s32.totalorder %s24_s26, %s1518_s25  ;;  %p1523_p6 = scmp.lt.s32.totalorder %s24_s26, %s24_s26 }
  0x2e   :  { %p1524_p7 = scmp.lt.s32.totalorder %s1522_s27, %s1518_s25 }
  0x30   :  { %p1525_p8 = por %p1524_p7, %p1523_p6 }
  0x32   :  { %p1526_p9 = pnand %p1525_p8, %p1519_p5 }
  0x34   :  { %1529 = shalt.err (!%p1526_p9)
}
  0x35   :  { %s1609_s5 = smov 224   ;;  %s1610_s24 = smov 14  }
  0x36   :  { %29 = dma.hbm_to_vmem [thread:$0]  %s1809_s0, 224, %s24_s26, [#allocation3], %s1609_s5, %s1609_s5, %s1610_s24  }
  0x37   :  { %s1611_s30 = smov [#allocation7]   ;;  %s1612_s12 = smov [#allocation10]  }
  0x38   :  { %s49_s11 = sshll.u32 %s1611_s30, 4  ;;  %s77_s13 = sshll.u32 %s1612_s12, 4  ;;  %s50_s11 = int_to_ptr.vmem [resolvable:$true] %s49_s11  ;;  %s78_s13 = int_to_ptr.vmem [resolvable:$true] %s77_s13 }
  0x39   :  { %s1530_s14 = scalar_lea.hbm %s1812_s3, 1024 }
  0x3a   :  { %p1531_p10 = scmp.ne.s32.totalorder %s1812_s3, %s1530_s14  ;;  %p1534_p11 = scmp.lt.u32.totalorder %s1530_s14, %s1812_s3 }
  0x3c   :  { %p1536_p12 = pnand %p1534_p11, %p1531_p10 }
  0x3e   :  { %1539 = shalt.err (!%p1536_p12)
}
  0x3f   :  { %s1540_s0 = scalar_lea.vmem %s50_s11, 1024  ;;  %p1545_p0 = scmp.lt.s32.totalorder %s50_s11, %s50_s11 }
  0x40   :  { %p1541_p13 = scmp.ne.s32.totalorder %s50_s11, %s1540_s0  ;;  %p1546_p1 = scmp.lt.s32.totalorder %s1540_s0, %s1540_s0 }
  0x42   :  { %p1547_p2 = por %p1546_p1, %p1545_p0 }
  0x44   :  { %p1548_p3 = pnand %p1547_p2, %p1541_p13 }
  0x46   :  { %1551 = shalt.err (!%p1548_p3)
}
  0x47   :  { %55 = dma.hbm_to_vmem [thread:$0]  %s1812_s3, 1024, %s50_s11, [#allocation6], %s1605_s19, %s1605_s19, %s1606_s20  }
  0x48   :  { %s1552_s25 = scalar_lea.hbm %s1816_s7, 1024 }
  0x49   :  { %p1553_p4 = scmp.ne.s32.totalorder %s1816_s7, %s1552_s25  ;;  %p1556_p5 = scmp.lt.u32.totalorder %s1552_s25, %s1816_s7 }
  0x4b   :  { %p1558_p6 = pnand %p1556_p5, %p1553_p4 }
  0x4d   :  { %1561 = shalt.err (!%p1558_p6)
}
  0x4e   :  { %s1562_s29 = scalar_lea.vmem %s78_s13, 1024  ;;  %p1567_p8 = scmp.lt.s32.totalorder %s78_s13, %s78_s13 }
  0x4f   :  { %p1563_p7 = scmp.ne.s32.totalorder %s78_s13, %s1562_s29  ;;  %p1568_p9 = scmp.lt.s32.totalorder %s1562_s29, %s1562_s29 }
  0x51   :  { %p1569_p10 = por %p1568_p9, %p1567_p8 }
  0x53   :  { %p1570_p11 = pnand %p1569_p10, %p1563_p7 }
  0x55   :  { %1573 = shalt.err (!%p1570_p11)
}
  0x56   :  { %83 = dma.hbm_to_vmem [thread:$0]  %s1816_s7, 1024, %s78_s13, [#allocation9], %s1605_s19, %s1605_s19, %s1606_s20  }
  0x57   :  { %1596 = dma.done.wait [#allocation3], 896  }
  0x58   :  { %1597 = vsyncadd [#allocation3], 4294966400 }
  0x59   :  { %1598 = dma.done.wait [#allocation6], 7296  }
  0x5a   :  { %1599 = vsyncadd [#allocation6], 4294960000 }
  0x5b   :  { %1600 = dma.done.wait [#allocation9], 2048  }
  0x5c   :  { %1601 = vsyncadd [#allocation9], 4294965248  ;;  %v1379_v0 = vld [vmem:[#allocation5 + $0x40] sm:$0xff]   ;;  %v1383_v4 = vld [vmem:[#allocation5 + $0x48] sm:$0xff]   ;;  %v1613_v23 = vmov 1983009808   ;;  %v125_v25 = vlaneseq }
  0x5d   :  { %v1380_v1 = vld [vmem:[#allocation5] sm:$0xff]   ;;  %1203 = vmatprep.subr.bf16.mxu0 %v1379_v0  ;;  %v1384_v5 = vld [vmem:[#allocation5 + $0x8] sm:$0xff]   ;;  %v1387_v8 = vld [vmem:[#allocation5 + $0x50] sm:$0xff]   ;;  %v123_v24 = vunpack.c.l.s4 %v1613_v23  ;;  %v1614_v47 = vmov 0.0   ;;  %vm1615_vm0 = vmmov 0   ;;  %vm602_vm1 = vcmask 130048  }
  0x5e   :  { %v1381_v2 = vld [vmem:[#allocation5 + $0xc0] sm:$0xff]   ;;  %1204 = vmatpush3.bf16.msra.mxu0 %v1380_v1  ;;  %v1385_v6 = vld [vmem:[#allocation5 + $0xc8] sm:$0xff]   ;;  %v1388_v9 = vld [vmem:[#allocation5 + $0x10] sm:$0xff]   ;;  %v126_v31 = vshrl.u32 %v125_v25, 7 }
  0x5f   :  { %v1382_v3 = vld [vmem:[#allocation5 + $0x80] sm:$0xff]   ;;  %1225 = vmatprep.subr.bf16.mxu1 %v1381_v2  ;;  %1205 = vmatprep.subr.bf16.mxu0 %v1383_v4  ;;  %v1386_v7 = vld [vmem:[#allocation5 + $0x88] sm:$0xff]   ;;  %v1389_v10 = vld [vmem:[#allocation5 + $0xd0] sm:$0xff]   ;;  %v124_v30 = vunpack.c.0.s8 %v123_v24 }
  0x60   :  { %1226 = vmatpush3.bf16.msra.mxu1 %v1382_v3  ;;  %v1390_v11 = vld [vmem:[#allocation5 + $0x90] sm:$0xff]   ;;  %v1391_v12 = vld [vmem:[#allocation5 + $0x58] sm:$0xff]   ;;  %v1395_v16 = vld [vmem:[#allocation5 + $0x60] sm:$0xff]  }
  0x61   :  { %1227 = vmatprep.subr.bf16.mxu1 %v1385_v6  ;;  %v1392_v13 = vld [vmem:[#allocation5 + $0x18] sm:$0xff]   ;;  %v1396_v17 = vld [vmem:[#allocation5 + $0x20] sm:$0xff]   ;;  %v1399_v20 = vld [vmem:[#allocation5 + $0x68] sm:$0xff]   ;;  %v1741_v36 = vsub.s32 %v124_v30, %v126_v31 }
  0x62   :  { %1206 = vmatpush3.bf16.msra.mxu0 %v1384_v5  ;;  %v1393_v14 = vld [vmem:[#allocation5 + $0xd8] sm:$0xff]   ;;  %v1397_v18 = vld [vmem:[#allocation5 + $0xe0] sm:$0xff]   ;;  %v1400_v21 = vld [vmem:[#allocation5 + $0x28] sm:$0xff]  }
  0x63   :  { %1207 = vmatprep.subr.bf16.mxu0 %v1387_v8  ;;  %v1394_v15 = vld [vmem:[#allocation5 + $0x98] sm:$0xff]   ;;  %v1398_v19 = vld [vmem:[#allocation5 + $0xa0] sm:$0xff]   ;;  %v1401_v22 = vld [vmem:[#allocation5 + $0xe8] sm:$0xff]  }
  0x64   :  { %1228 = vmatpush3.bf16.msra.mxu1 %v1386_v7  ;;  %v1402_v26 = vld [vmem:[#allocation5 + $0xa8] sm:$0xff]   ;;  %v1403_v27 = vld [vmem:[#allocation5 + $0x70] sm:$0xff]   ;;  %v1407_v33 = vld [vmem:[#allocation5 + $0x78] sm:$0xff]  }
  0x65   :  { %1229 = vmatprep.subr.bf16.mxu1 %v1389_v10  ;;  %v1404_v28 = vld [vmem:[#allocation5 + $0x30] sm:$0xff]   ;;  %v1408_v34 = vld [vmem:[#allocation5 + $0x38] sm:$0xff]   ;;  %v1415_v42 = vld [vmem:[#allocation5 + $0x140] sm:$0xff]  }
  0x66   :  { %1208 = vmatpush3.bf16.msra.mxu0 %v1388_v9  ;;  %v1405_v29 = vld [vmem:[#allocation5 + $0xf0] sm:$0xff]   ;;  %v1409_v35 = vld [vmem:[#allocation5 + $0xf8] sm:$0xff]   ;;  %v1418_v52 = vld [vmem:[#allocation5 + $0x100] sm:$0xff]  }
  0x67   :  { %1209 = vmatprep.subr.bf16.mxu0 %v1391_v12  ;;  %v1406_v32 = vld [vmem:[#allocation5 + $0xb0] sm:$0xff]   ;;  %v1414_v39 = vld [vmem:[#allocation5 + $0xb8] sm:$0xff]   ;;  %v1419_v55 = vld [vmem:[#allocation5 + $0x148] sm:$0xff]  }
  0x68   :  { %1230 = vmatpush3.bf16.msra.mxu1 %v1390_v11  ;;  %v1410_v37 = vld [vmem:[#allocation2] ss:$14 sps:$4 sm:$0xff]   ;;  %v1412_v38 = vld [vmem:[#allocation2 + $0x1c] ss:$14 sps:$4 sm:$0xff]   ;;  %v1416_v43 = vld [vmem:[#allocation2 + $0x4] ss:$14 sps:$4 sm:$0xff]  }
  0x69   :  { %1231 = vmatprep.subr.bf16.mxu1 %v1393_v14  ;;  %v128_v40 = vrot.slane %v1410_v37, %v1741_v36  ;;  %v142_v41 = vrot.slane %v1412_v38, %v1741_v36  ;;  %v1417_v44 = vld [vmem:[#allocation2 + $0x20] ss:$14 sps:$4 sm:$0xff]   ;;  %v135_v48 = vrot.slane %v1416_v43, %v1741_v36  ;;  %v1425_v63 = vld [vmem:[#allocation5 + $0x160] sm:$0xff]   ;;  %v1437_v5 = vld [vmem:[#allocation2 + $0x24] ss:$14 sps:$4 sm:$0xff]  }
  0x6a   :  { %1210 = vmatpush3.bf16.msra.mxu0 %v1392_v13  ;;  %v149_v49 = vrot.slane %v1417_v44, %v1741_v36  ;;  %v1420_v58 = vld [vmem:[#allocation5 + $0x108] sm:$0xff]   ;;  %v1421_v59 = vld [vmem:[#allocation5 + $0x150] sm:$0xff]   ;;  %v1423_v61 = vld [vmem:[#allocation5 + $0x158] sm:$0xff]   ;;  %v178_v10 = vrot.slane %v1437_v5, %v1741_v36 }
  0x6b   :  { %1211 = vmatprep.subr.bf16.mxu0 %v1395_v16  ;;  %v151_v45 = vcombine.high %v128_v40, %v142_v41  ;;  %v150_v46 = vcombine.low %v128_v40, %v142_v41  ;;  %v1422_v60 = vld [vmem:[#allocation5 + $0x110] sm:$0xff]   ;;  %v1424_v62 = vld [vmem:[#allocation5 + $0x118] sm:$0xff]   ;;  %v1433_v0 = vld [vmem:[#allocation5 + $0x180] sm:$0xff]  }
  0x6c   :  { %1232 = vmatpush3.bf16.msra.mxu1 %v1394_v15  ;;  %v153_v53 = vcombine.high %v135_v48, %v149_v49  ;;  %v152_v54 = vcombine.low %v135_v48, %v149_v49  ;;  %v1426_v1 = vld [vmem:[#allocation5 + $0x120] sm:$0xff]   ;;  %v1427_v4 = vld [vmem:[#allocation5 + $0x168] sm:$0xff]   ;;  %v1439_v6 = vld [vmem:[#allocation2 + $0x28] ss:$14 sps:$4 sm:$0x33]  }
  0x6d   :  { %1233 = vmatprep.subr.bf16.mxu1 %v1397_v18  ;;  %v197_v50 = vpack.c.bf16 %v151_v45, %v151_v45  ;;  %v196_v51 = vpack.c.bf16 %v150_v46, %v150_v46  ;;  %v1434_v2 = vld [vmem:[#allocation2 + $0x8] ss:$14 sps:$4 sm:$0xff]   ;;  %v1436_v3 = vld [vmem:[#allocation2 + $0xc] ss:$14 sps:$4 sm:$0x33]   ;;  %v1428_v9 = vld [vmem:[#allocation5 + $0x128] sm:$0xff]   ;;  %v185_v11 = vrot.slane %v1439_v6, %v1741_v36 }
  0x6e   :  { %1212 = vmatpush3.bf16.msra.mxu0 %v1396_v17  ;;  %v199_v56 = vpack.c.bf16 %v153_v53, %v153_v53  ;;  %v198_v57 = vpack.c.bf16 %v152_v54, %v152_v54  ;;  %v164_v7 = vrot.slane %v1434_v2, %v1741_v36  ;;  %v171_v8 = vrot.slane %v1436_v3, %v1741_v36  ;;  %v1429_v12 = vld [vmem:[#allocation5 + $0x170] sm:$0xff]   ;;  %v1431_v18 = vld [vmem:[#allocation5 + $0x178] sm:$0xff]   ;;  %v1443_v25 = vld [vmem:[#allocation7 + $0x18] sm:$0xff]  }
  0x6f   :  { %1213 = vmatprep.subr.bf16.mxu0 %v1399_v20  ;;  %638 = vmatprep.mubr.bf16.mxu0 %v197_v50  ;;  %v1430_v15 = vld [vmem:[#allocation5 + $0x130] sm:$0xff]   ;;  %v1442_v24 = vld [vmem:[#allocation7 + $0x10] sm:$0xff]   ;;  %v1448_v30 = vld [vmem:[#allocation8] sm:$0xff]  }
  0x70   :  { %1234 = vmatpush3.bf16.msra.mxu1 %v1398_v19  ;;  %678 = vmatprep.mubr.bf16.mxu1 %v199_v56  ;;  %v187_v13 = vcombine.high %v164_v7, %v178_v10  ;;  %v188_v14 = vcombine.low %v171_v8, %v185_v11  ;;  %v1432_v19 = vld [vmem:[#allocation5 + $0x138] sm:$0xff]   ;;  %v186_v20 = vcombine.low %v164_v7, %v178_v10  ;;  %v1441_v23 = vld [vmem:[#allocation7 + $0x8] sm:$0xff]   ;;  %v1125_v37 = vld [vmem:[%s1811_s2] ss:$0 sm:$0xff] }
  0x71   :  { %1235 = vmatprep.subr.bf16.mxu1 %v1401_v22  ;;  %v1440_v22 = vld [vmem:[#allocation7] sm:$0xff]   ;;  %v1449_v31 = vld [vmem:[#allocation8 + $0x8] sm:$0xff]   ;;  %v1458_v3 = vld [vmem:[#allocation10 + $0x10] sm:$0xff]  }
  0x72   :  { %1214 = vmatpush3.bf16.msra.mxu0 %v1400_v21  ;;  %v201_v16 = vpack.c.bf16 %v187_v13, %v187_v13  ;;  %v202_v17 = vpack.c.bf16 %v188_v14, %v188_v14  ;;  %v200_v21 = vpack.c.bf16 %v186_v20, %v186_v20  ;;  %v1457_v2 = vld [vmem:[#allocation10 + $0x8] sm:$0xff]   ;;  %v1460_v5 = vld [vmem:[#allocation10 + $0x20] sm:$0xff]  }
  0x73   :  { %1215 = vmatprep.subr.bf16.mxu0 %v1403_v27  ;;  %v1445_v27 = vld [vmem:[#allocation7 + $0x28] sm:$0xff]   ;;  %v1176_v7 = vld [vmem:[%s1813_s4] ss:$0 sm:$0xff] }
  0x74   :  { %1236 = vmatpush3.bf16.msra.mxu1 %v1402_v26  ;;  %v1444_v26 = vld [vmem:[#allocation7 + $0x20] sm:$0xff]   ;;  %v1461_v6 = vld [vmem:[#allocation10 + $0x28] sm:$0xff]  }
  0x75   :  { %1237 = vmatprep.subr.bf16.mxu1 %v1405_v29  ;;  %v1447_v29 = vld [vmem:[#allocation7 + $0x38] sm:$0xff]  }
  0x76   :  { %1216 = vmatpush3.bf16.msra.mxu0 %v1404_v28  ;;  %v1446_v28 = vld [vmem:[#allocation7 + $0x30] sm:$0xff]  }
  0x77   :  { %1217 = vmatprep.subr.bf16.mxu0 %v1407_v33  ;;  %v1451_v33 = vld [vmem:[#allocation8 + $0x18] sm:$0xff]  }
  0x78   :  { %1238 = vmatpush3.bf16.msra.mxu1 %v1406_v32  ;;  %v1450_v32 = vld [vmem:[#allocation8 + $0x10] sm:$0xff]  }
  0x79   :  { %1239 = vmatprep.subr.bf16.mxu1 %v1409_v35  ;;  %v1453_v35 = vld [vmem:[#allocation8 + $0x28] sm:$0xff]  }
  0x7a   :  { %1218 = vmatpush3.bf16.msra.mxu0 %v1408_v34  ;;  %v1452_v34 = vld [vmem:[#allocation8 + $0x20] sm:$0xff]  }
  0x7b   :  { %1247 = vmatprep.subr.bf16.mxu0 %v1415_v42 }
  0x7c   :  { %1240 = vmatpush3.bf16.msra.mxu1 %v1414_v39 }
  0x7d   :  { %1298 = vmatprep.subr.bf16.mxu1 %v1614_v47  ;;  %639 = vmatmul.mubr.bf16.vlgmr.msra.gmra.mrb[0].mxu0 %v196_v51 }
  0x7e   :  { %1248 = vmatpush3.bf16.msra.mxu0 %v1418_v52  ;;  %718 = vmatprep.mubr.bf16.mxu0 %v201_v16  ;;  %v1463_v16 = vld [vmem:[#allocation10 + $0x38] sm:$0xff]  }
  0x7f   :  { %1249 = vmatprep.subr.bf16.mxu0 %v1419_v55  ;;  %679 = vmatmul.mubr.bf16.vlgmr.msra.gmra.mrb[0].mxu1 %v198_v57 }
  0x80   :  { %1300 = vmatprep.mubr.msk.bf16.mxu1 %vm1615_vm0, %v1614_v47  ;;  %1299 = vmatpush3.bf16.msra.mxu1 %v1433_v0  ;;  %v1455_v0 = vld [vmem:[#allocation8 + $0x38] sm:$0xff]  }
  0x81   :  { %1304 = vmatprep.subr.bf16.mxu1 %v1614_v47 }
  0x82   :  { %1250 = vmatpush3.bf16.msra.mxu0 %v1420_v58 }
  0x83   :  { %1251 = vmatprep.subr.bf16.mxu0 %v1421_v59 }
  0x86   :  { %1252 = vmatpush3.bf16.msra.mxu0 %v1422_v60 }
  0x87   :  { %1253 = vmatprep.subr.bf16.mxu0 %v1423_v61  ;;  %1301 = vmatmul.mubr.msk.bf16.vlgmr.msra.gmra.mrb[4].mxu1 %vm602_vm1, %v202_v17  ;;  %v1185_v17 = vld [vmem:[%s1815_s6] ss:$0 sm:$0xff] }
  0x88   :  { %1320 = vmatprep.mubr.msk.bf16.mxu1 %vm1615_vm0, %v1614_v47  ;;  %1305 = vmatpush3.bf16.msra.mxu1 %v1440_v22 }
  0x89   :  { %1306 = vmatprep.subr.bf16.mxu1 %v1614_v47 }
  0x8a   :  { %1254 = vmatpush3.bf16.msra.mxu0 %v1424_v62 }
  0x8b   :  { %1255 = vmatprep.subr.bf16.mxu0 %v1425_v63  ;;  %v1454_v63 = vld [vmem:[#allocation8 + $0x30] sm:$0xff]  }
  0x8c   :  { %1307 = vmatpush3.bf16.msra.mxu1 %v1441_v23 }
  0x8d   :  { %1308 = vmatprep.subr.bf16.mxu1 %v1614_v47 }
  0x8e   :  { %1256 = vmatpush3.bf16.msra.mxu0 %v1426_v1  ;;  %v1456_v1 = vld [vmem:[#allocation10] sm:$0xff]  }
  0x8f   :  { %1257 = vmatprep.subr.bf16.mxu0 %v1427_v4  ;;  %v1459_v4 = vld [vmem:[#allocation10 + $0x18] sm:$0xff]  }
  0x90   :  { %1309 = vmatpush3.bf16.msra.mxu1 %v1442_v24 }
  0x91   :  { %1310 = vmatprep.subr.bf16.mxu1 %v1614_v47 }
  0x92   :  { %1258 = vmatpush3.bf16.msra.mxu0 %v1428_v9 }
  0x93   :  { %1259 = vmatprep.subr.bf16.mxu0 %v1429_v12 }
  0x94   :  { %1311 = vmatpush3.bf16.msra.mxu1 %v1443_v25  ;;  %v1194_v25 = vld [vmem:[%s1817_s8] ss:$0 sm:$0xff] }
  0x95   :  { %1312 = vmatprep.subr.bf16.mxu1 %v1614_v47 }
  0x96   :  { %1260 = vmatpush3.bf16.msra.mxu0 %v1430_v15  ;;  %v1462_v15 = vld [vmem:[#allocation10 + $0x30] sm:$0xff]  }
  0x97   :  { %1261 = vmatprep.subr.bf16.mxu0 %v1431_v18 }
  0x98   :  { %1313 = vmatpush3.bf16.msra.mxu1 %v1444_v26 }
  0x99   :  { %1314 = vmatprep.subr.bf16.mxu1 %v1614_v47 }
  0x9a   :  { %1262 = vmatpush3.bf16.msra.mxu0 %v1432_v19 }
  0x9b   :  { %1324 = vmatprep.subr.bf16.mxu0 %v1614_v47 }
  0x9c   :  { %1315 = vmatpush3.bf16.msra.mxu1 %v1445_v27 }
  0x9d   :  { %719 = vmatmul.mubr.bf16.vlgmr.msra.gmra.mrb[4].mxu0 %v200_v21  ;;  %1316 = vmatprep.subr.bf16.mxu1 %v1614_v47 }
  0x9e   :  { %1340 = vmatprep.mubr.msk.bf16.mxu0 %vm1615_vm0, %v1614_v47  ;;  %1325 = vmatpush3.bf16.msra.mxu0 %v1448_v30 }
  0x9f   :  { %1326 = vmatprep.subr.bf16.mxu0 %v1614_v47 }
  0xa0   :  { %1317 = vmatpush3.bf16.msra.mxu1 %v1446_v28 }
  0xa1   :  { %1318 = vmatprep.subr.bf16.mxu1 %v1614_v47 }
  0xa2   :  { %1327 = vmatpush3.bf16.msra.mxu0 %v1449_v31 }
  0xa3   :  { %1328 = vmatprep.subr.bf16.mxu0 %v1614_v47 }
  0xa4   :  { %1319 = vmatpush3.bf16.msra.mxu1 %v1447_v29 }
  0xa5   :  { %1344 = vmatprep.subr.bf16.mxu1 %v1614_v47 }
  0xa6   :  { %1329 = vmatpush3.bf16.msra.mxu0 %v1450_v32 }
  0xa7   :  { %1330 = vmatprep.subr.bf16.mxu0 %v1614_v47 }
  0xaa   :  { %1331 = vmatpush3.bf16.msra.mxu0 %v1451_v33 }
  0xab   :  { %1332 = vmatprep.subr.bf16.mxu0 %v1614_v47 }
  0xae   :  { %1333 = vmatpush3.bf16.msra.mxu0 %v1452_v34 }
  0xaf   :  { %1334 = vmatprep.subr.bf16.mxu0 %v1614_v47 }
  0xb2   :  { %1335 = vmatpush3.bf16.msra.mxu0 %v1453_v35 }
  0xb3   :  { %1336 = vmatprep.subr.bf16.mxu0 %v1614_v47 }
  0xb6   :  { %1337 = vmatpush3.bf16.msra.mxu0 %v1454_v63 }
  0xb7   :  { %1338 = vmatprep.subr.bf16.mxu0 %v1614_v47 }
  0xba   :  { %1339 = vmatpush3.bf16.msra.mxu0 %v1455_v0 }
 0x150   :  { %v1219_v36 = vpop.f32.mrb[0].mxu0 }
 0x151   :  { %v1220_v38 = vpop.f32.mrb[1].mxu0 }
 0x152   :  { %v1221_v39 = vadd.f32 %v1220_v38, %v1219_v36  ;;  %v1222_v40 = vpop.f32.mrb[2].mxu0  ;;  %v1241_v41 = vpop.f32.mrb[0].mxu1 }
 0x153   :  { %v1223_v42 = vpop.f32.mrb[3].mxu0  ;;  %v1242_v44 = vpop.f32.mrb[1].mxu1 }
 0x154   :  { %v641_v43 = vadd.f32 %v1221_v39, %v1125_v37  ;;  %v1243_v45 = vadd.f32 %v1242_v44, %v1241_v41  ;;  %v1244_v46 = vpop.f32.mrb[2].mxu1 }
 0x155   :  { %v1245_v48 = vpop.f32.mrb[3].mxu1 }
 0x156   :  { %v681_v49 = vadd.f32 %v1243_v45, %v641_v43 }
 0x15a   :  { %v760_v50 = vpop.f32.mrb[4].mxu1 }
 0x15b   :  { %v1302_v51 = vpop.f32.mrb[5].mxu1 }
 0x15c   :  { %v763_v52 = vpop.f32.mrb[6].mxu1 }
 0x15d   :  { %v1303_v53 = vpop.f32.mrb[7].mxu1 }
 0x170   :  { %v1263_v54 = vpop.f32.mrb[4].mxu0 }
 0x171   :  { %v1264_v55 = vpop.f32.mrb[5].mxu0 }
 0x172   :  { %v1265_v56 = vadd.f32 %v1264_v55, %v1263_v54  ;;  %v1266_v57 = vpop.f32.mrb[6].mxu0 }
 0x173   :  { %v1267_v58 = vpop.f32.mrb[7].mxu0 }
 0x174   :  { %v721_v59 = vadd.f32 %v1265_v56, %v681_v49 }
 0x176   :  { %v761_v60 = vadd.f32 %v760_v50, %v721_v59 }
 0x178   :  { %v766_v61 = vmax.f32 %v761_v60, 0.0 }
 0x17a   :  { %v767_v62 = vpack.c.bf16 %v766_v61, %v766_v61 }
 0x17c   :  { %1321 = vmatmul.mubr.bf16.vlgmr.msra.gmra.mrb[8].mxu1 %v767_v62 }
 0x17d   :  { %1360 = vmatprep.mubr.msk.bf16.mxu1 %vm1615_vm0, %v1614_v47  ;;  %1345 = vmatpush3.bf16.msra.mxu1 %v1456_v1 }
 0x17e   :  { %1346 = vmatprep.subr.bf16.mxu1 %v1614_v47 }
 0x181   :  { %1347 = vmatpush3.bf16.msra.mxu1 %v1457_v2 }
 0x182   :  { %1348 = vmatprep.subr.bf16.mxu1 %v1614_v47 }
 0x185   :  { %1349 = vmatpush3.bf16.msra.mxu1 %v1458_v3 }
 0x186   :  { %1350 = vmatprep.subr.bf16.mxu1 %v1614_v47 }
 0x189   :  { %1351 = vmatpush3.bf16.msra.mxu1 %v1459_v4 }
 0x18a   :  { %1352 = vmatprep.subr.bf16.mxu1 %v1614_v47 }
 0x18d   :  { %1353 = vmatpush3.bf16.msra.mxu1 %v1460_v5 }
 0x18e   :  { %1354 = vmatprep.subr.bf16.mxu1 %v1614_v47 }
 0x191   :  { %1355 = vmatpush3.bf16.msra.mxu1 %v1461_v6 }
 0x192   :  { %1356 = vmatprep.subr.bf16.mxu1 %v1614_v47 }
 0x195   :  { %1357 = vmatpush3.bf16.msra.mxu1 %v1462_v15 }
 0x196   :  { %1358 = vmatprep.subr.bf16.mxu1 %v1614_v47 }
 0x199   :  { %1359 = vmatpush3.bf16.msra.mxu1 %v1463_v16 }
 0x24f   :  { %v873_v8 = vpop.f32.mrb[8].mxu1 }
 0x250   :  { %v874_v9 = vadd.f32 %v1176_v7, %v873_v8  ;;  %v1322_v10 = vpop.f32.mrb[9].mxu1 }
 0x251   :  { %v876_v11 = vpop.f32.mrb[10].mxu1 }
 0x252   :  { %v879_v12 = vmax.f32 %v874_v9, 0.0  ;;  %v1323_v13 = vpop.f32.mrb[11].mxu1 }
 0x254   :  { %v880_v14 = vpack.c.bf16 %v879_v12, %v879_v12 }
 0x256   :  { %1341 = vmatmul.mubr.bf16.vlgmr.msra.gmra.mrb[8].mxu0 %v880_v14 }
 0x329   :  { %v986_v18 = vpop.f32.mrb[8].mxu0 }
 0x32a   :  { %v987_v19 = vadd.f32 %v1185_v17, %v986_v18  ;;  %v1342_v20 = vpop.f32.mrb[9].mxu0 }
 0x32b   :  { %v989_v21 = vpop.f32.mrb[10].mxu0 }
 0x32c   :  { %v992_v22 = vmax.f32 %v987_v19, 0.0  ;;  %v1343_v23 = vpop.f32.mrb[11].mxu0 }
 0x32e   :  { %v993_v24 = vpack.c.bf16 %v992_v22, %v992_v22 }
 0x330   :  { %1361 = vmatmul.mubr.bf16.vlgmr.msra.gmra.mrb[12].mxu1 %v993_v24 }
 0x403   :  { %v1099_v26 = vpop.f32.mrb[12].mxu1 }
 0x404   :  { %v1100_v47 = vadd.f32 %v1194_v25, %v1099_v26  ;;  %v1362_v27 = vpop.f32.mrb[13].mxu1 }
 0x405   :  { %v1102_v28 = vpop.f32.mrb[14].mxu1 }
 0x406   :  { %1105 = vst [vmem:[#allocation11] sm:$0xff] %v1100_v47  ;;  %v1363_v29 = vpop.f32.mrb[15].mxu1 }
 0x407   :  { %1110 = vsyncadd [#allocation4], 96  ;;  %s1616_s6 = smov [#allocation11]  }
 0x408   :  { %s1111_s1 = sshll.u32 %s1616_s6, 4  ;;  %s1112_s1 = int_to_ptr.vmem [resolvable:$true] %s1111_s1 }
 0x409   :  { %s1574_s10 = scalar_lea.vmem %s1112_s1, 32  ;;  %s1578_s14 = scalar_lea.vmem %s1112_s1, 128 }
 0x40a   :  { %p1575_p12 = scmp.ne.s32.totalorder %s1112_s1, %s1574_s10  ;;  %p1579_p13 = scmp.lt.s32.totalorder %s1112_s1, %s1112_s1 }
 0x40b   :  { %p1580_p0 = scmp.lt.s32.totalorder %s1578_s14, %s1574_s10 }
 0x40d   :  { %p1581_p1 = por %p1580_p0, %p1579_p13 }
 0x40f   :  { %p1582_p2 = pnand %p1581_p1, %p1575_p12 }
 0x411   :  { %1585 = shalt.err (!%p1582_p2)
}
 0x412   :  { %s1586_s16 = scalar_lea.hbm %s1818_s9, 32 }
 0x413   :  { %p1587_p3 = scmp.ne.s32.totalorder %s1818_s9, %s1586_s16  ;;  %p1590_p4 = scmp.lt.u32.totalorder %s1586_s16, %s1818_s9 }
 0x415   :  { %p1592_p5 = pnand %p1590_p4, %p1587_p3 }
 0x417   :  { %1595 = shalt.err (!%p1592_p5)
}
 0x418   :  { %s1617_s21 = smov 32   ;;  %s1618_s22 = smov 2  }
 0x419   :  { %1117 = dma.vmem_to_hbm [thread:$0]  %s1112_s1, 32, %s1818_s9, [#allocation4], %s1617_s21, %s1617_s21, %s1618_s22  }
 0x41a   :  { %1602 = dma.done.wait [#allocation4], 128  }
 0x41b   :  { %1603 = vsyncadd [#allocation4], 4294967168 }
 0x41c   :  { %1121 = vsyncpa [#allocation3], 1 }
 0x41d   :  { %1122 = vsyncpa [#allocation6], 1 }
 0x41e   :  { %1123 = vsyncpa [#allocation9], 1 }
 0x41f   :  { %1124 = vsyncpa [#allocation4], 1 }

</bundles_post_ra>
